<compile_context>
chip_gen: v6e
topology: v6e:2x2x1
jax: 0.10.0
libtpu: 0.0.40
codegen_flags: <defaults>
</compile_context>

<pallas_src>
import numpy as np
import jax
import jax.numpy as jnp
from jax.experimental import pallas as pl
from jax.experimental.pallas import tpu as pltpu

LANE = 128


def _round_up(n, m):
    return ((n + m - 1) // m) * m


# ----------------------------- Pallas kernel --------------------------------

def make_multi_cnn_kernel(TB, L, D, Kmax, NCp):
    """Kernel closing over static tile shapes."""
    TWO_D = 2 * D

    def kernel(x_ref, mask_ref, cw_ref, cb_ref,
               fc1w_ref, fc1b_ref, fc2w_ref, fc2b_ref, out_ref):
        # --- conv for ALL filter widths: per-tap matmul accumulation --------
        # x_ref: (TB, L + Kmax - 1, 2*D), zero-padded in time by the wrapper.
        # cw_ref: (Kmax, 2*D, NCp) fused / zero-padded conv weight slab.
        acc = jnp.zeros((TB * L, NCp), jnp.float32)
        for k in range(Kmax):                       # static unrolled taps
            xk = x_ref[:, k:k + L, :].reshape(TB * L, TWO_D)
            acc = acc + jnp.dot(xk, cw_ref[k],
                                preferred_element_type=jnp.float32)

        # --- mask invalid time positions (precomputed {0,-inf}), max over t -
        conv = acc.reshape(TB, L, NCp) + mask_ref[...]    # broadcast (L, NCp)
        pooled = jnp.max(conv, axis=1) + cb_ref[...]      # bias after the pool
        feat = jnp.maximum(pooled, 0.0)                   # ReLU (commutes w/ max)

        # TODO(synk): dropout is eval-mode identity (no randomness applied).

        # --- fc1 + ReLU + fc2 (all lane-padded to 128) -----------------------
        h = jnp.dot(feat, fc1w_ref[...],
                    preferred_element_type=jnp.float32) + fc1b_ref[...]
        h = jnp.maximum(h, 0.0)
        out_ref[...] = jnp.dot(h, fc2w_ref[...],
                               preferred_element_type=jnp.float32) + fc2b_ref[...]

    return kernel


# ------------------------- parameter fusion / padding -------------------------

def fuse_params(raw, kernel_sizes, lane=LANE):
    """Fuse per-filter conv weights into one (Kmax, 2*D, NCp) slab; pad fc layers.

    All padded feature dims are rounded UP to a multiple of 128 lanes.
    """
    conv_w_pt = [np.asarray(w) for w in raw["conv_w_pt"]]   # each (C, 2, K, D)
    C, _, _, D = conv_w_pt[0].shape
    Kmax = max(kernel_sizes)
    NC = len(kernel_sizes) * C
    NCp = _round_up(NC, lane)

    conv_w = np.zeros((Kmax, 2 * D, NCp), np.float32)
    conv_b = np.zeros((1, NCp), np.float32)
    for i, K in enumerate(kernel_sizes):
        w = conv_w_pt[i]                                     # (C, 2, K, D)
        for k in range(K):
            # (C, 2, D) -> (2, D, C) -> (2*D, C); row order = (channel, d),
            # channel 0 = static embedding, channel 1 = no-static embedding.
            conv_w[k, :, i * C:(i + 1) * C] = (
                np.transpose(w[:, :, k, :], (1, 2, 0)).reshape(2 * D, C))
        conv_b[0, i * C:(i + 1) * C] = np.asarray(raw["conv_b"][i])

    in_fea, hidden = raw["fc1_w"].shape
    label_num = raw["fc2_w"].shape[1]
    Hp = _round_up(hidden, lane)
    Op = _round_up(label_num, lane)

    fc1_w = np.zeros((NCp, Hp), np.float32)
    fc1_w[:in_fea, :hidden] = np.asarray(raw["fc1_w"])
    fc1_b = np.zeros((1, Hp), np.float32)
    fc1_b[0, :hidden] = np.asarray(raw["fc1_b"])
    fc2_w = np.zeros((Hp, Op), np.float32)
    fc2_w[:hidden, :label_num] = np.asarray(raw["fc2_w"])
    fc2_b = np.zeros((1, Op), np.float32)
    fc2_b[0, :label_num] = np.asarray(raw["fc2_b"])

    return {
        "embed_no_static": raw["embed_no_static"],
        "embed_static": raw["embed_static"],
        "conv_w": jnp.asarray(conv_w), "conv_b": jnp.asarray(conv_b),
        "fc1_w": jnp.asarray(fc1_w), "fc1_b": jnp.asarray(fc1_b),
        "fc2_w": jnp.asarray(fc2_w), "fc2_b": jnp.asarray(fc2_b),
        "C": C, "D": D, "Kmax": Kmax, "NCp": NCp, "label_num": label_num,
    }


# ------------------------------ wrapper (glue) -------------------------------

def multi_cnn_forward(x_ids, fused, kernel_sizes):
    # Embedding lookups (gather) in plain JAX; channel 0 = static (matches the
    # PyTorch torch.stack([x_static, x_no_static], 1) channel order).
    emb_s = fused["embed_static"][x_ids]          # (B, L, D) channel 0
    emb_n = fused["embed_no_static"][x_ids]       # (B, L, D) channel 1
    B, L, D = emb_s.shape
    Kmax = fused["Kmax"]
    assert L >= Kmax, "every filter width needs at least one valid time step"
    C, NCp = fused["C"], fused["NCp"]
    Hp = fused["fc1_w"].shape[1]
    Op = fused["fc2_w"].shape[1]

    # Channel concat + time zero-pad in the wrapper (fuses with the gather).
    x = jnp.concatenate([emb_s, emb_n], axis=-1)              # (B, L, 2*D)
    x = jnp.pad(x, ((0, 0), (0, Kmax - 1), (0, 0)))           # (B, Lp, 2*D)
    Lp = L + Kmax - 1

    # Static {0, -inf} time-validity mask, one column group per filter width.
    mask_np = np.zeros((L, NCp), np.float32)
    for i, K in enumerate(kernel_sizes):
        mask_np[L - K + 1:, i * C:(i + 1) * C] = -np.inf      # t > L-K invalid
    mask = jnp.asarray(mask_np)

    # Batch tile: aim for TB*L >= 256 (MXU M dim), TB a multiple of 8 when the
    # batch is actually split; pad batch with zeros to a multiple of TB.
    tb_target = _round_up(max(1, pl.cdiv(256, L)), 8)
    TB = min(B, tb_target)
    Bp = pl.cdiv(B, TB) * TB
    if Bp != B:
        x = jnp.pad(x, ((0, Bp - B), (0, 0), (0, 0)))
    grid = (Bp // TB,)

    kern = make_multi_cnn_kernel(TB, L, D, Kmax, NCp)
    out = pl.pallas_call(
        kern,
        out_shape=jax.ShapeDtypeStruct((Bp, Op), jnp.float32),
        grid_spec=pltpu.PrefetchScalarGridSpec(
            num_scalar_prefetch=0,
            grid=grid,
            in_specs=[
                # activation tile: pipelined over the batch grid
                pl.BlockSpec((TB, Lp, 2 * D), lambda i: (i, 0, 0)),
                # constants: same block every step -> VMEM-resident
                pl.BlockSpec((L, NCp), lambda i: (0, 0)),
                pl.BlockSpec((Kmax, 2 * D, NCp), lambda i: (0, 0, 0)),
                pl.BlockSpec((1, NCp), lambda i: (0, 0)),
                pl.BlockSpec((NCp, Hp), lambda i: (0, 0)),
                pl.BlockSpec((1, Hp), lambda i: (0, 0)),
                pl.BlockSpec((Hp, Op), lambda i: (0, 0)),
                pl.BlockSpec((1, Op), lambda i: (0, 0)),
            ],
            out_specs=pl.BlockSpec((TB, Op), lambda i: (i, 0)),
        ),
        compiler_params=pltpu.CompilerParams(
            dimension_semantics=("parallel",),          # shards over 2 TCs on v7x
            vmem_limit_bytes=32 * 1024 * 1024,          # safe on v5e/v6e/v7x
        ),
    )(x, mask, fused["conv_w"], fused["conv_b"],
      fused["fc1_w"], fused["fc1_b"], fused["fc2_w"], fused["fc2_b"])
    return out[:B, :fused["label_num"]]


# --------------------------- pure-JAX reference ------------------------------

def reference_forward(x_ids, raw, kernel_sizes):
    x_no_static = raw["embed_no_static"][x_ids]
    x_static = raw["embed_static"][x_ids]
    x = jnp.stack([x_static, x_no_static], axis=1)   # (B, 2, L, D) == NCHW
    feats = []
    for i, K in enumerate(kernel_sizes):
        w = raw["conv_w_pt"][i]                      # (C, 2, K, D)
        bias = raw["conv_b"][i]                      # (C,)
        out_len = x.shape[2] - K + 1
        outs = []
        for t in range(out_len):
            win = x[:, :, t:t + K, :]                # (B, 2, K, D)
            outs.append(jnp.einsum("bikd,cikd->bc", win, w))
        conv = jnp.stack(outs, axis=2) + bias[None, :, None]   # (B, C, out_len)
        conv = jnp.maximum(conv, 0.0)
        feats.append(jnp.max(conv, axis=2))          # (B, C)
    feat = jnp.concatenate(feats, axis=1)            # (B, n_ks*C)
    h = jnp.maximum(feat @ raw["fc1_w"] + raw["fc1_b"], 0.0)
    return h @ raw["fc2_w"] + raw["fc2_b"]


# --------------------------------- main ---------------------------------------

if __name__ == "__main__":
    # Small, module-consistent shapes.
    VOCAB = 50          # vocab.m_size
    VOCAB_MUI = 50      # opts.embed_num_mui
    D = 32              # opts.embed_dim
    C = 4               # opts.kernel_num
    KERNEL_SIZES = (3, 4, 5)   # opts.kernel_sizes
    LABEL_NUM = 5       # label_vocab.m_size
    B, L = 2, 8
    PAD_ID = 0

    in_fea = len(KERNEL_SIZES) * C
    hidden = in_fea // 2

    key = jax.random.PRNGKey(0)
    ks = jax.random.split(key, 16)

    # Deterministic synthetic parameters (shapes match the nn.Module).
    embed_no_static = 0.1 * jax.random.normal(ks[0], (VOCAB, D), jnp.float32)
    embed_static = 0.1 * jax.random.normal(ks[1], (VOCAB_MUI, D), jnp.float32)
    embed_no_static = embed_no_static.at[PAD_ID].set(0.0)   # padding_idx
    embed_static = embed_static.at[PAD_ID].set(0.0)

    conv_w_pt, conv_b = [], []
    for i, K in enumerate(KERNEL_SIZES):
        w = 0.1 * jax.random.normal(ks[2 + i], (C, 2, K, D), jnp.float32)
        conv_w_pt.append(w)
        # Non-zero bias to exercise the -inf time-mask path.
        conv_b.append(0.05 * jax.random.normal(ks[5 + i], (C,), jnp.float32))

    fc1_w = 0.1 * jax.random.normal(ks[8], (in_fea, hidden), jnp.float32)
    fc1_b = 0.05 * jax.random.normal(ks[9], (hidden,), jnp.float32)
    fc2_w = 0.1 * jax.random.normal(ks[10], (hidden, LABEL_NUM), jnp.float32)
    fc2_b = 0.05 * jax.random.normal(ks[11], (LABEL_NUM,), jnp.float32)

    raw = {
        "embed_no_static": embed_no_static,
        "embed_static": embed_static,
        "conv_w_pt": conv_w_pt,
        "conv_b": conv_b,
        "fc1_w": fc1_w,
        "fc1_b": fc1_b,
        "fc2_w": fc2_w,
        "fc2_b": fc2_b,
    }
    fused = fuse_params(raw, KERNEL_SIZES)

    # Token-id input (B, L), like the PyTorch module's `x`.
    x_ids = jax.random.randint(ks[12], (B, L), 0, VOCAB, dtype=jnp.int32)

    forward = jax.jit(lambda ids: multi_cnn_forward(ids, fused, KERNEL_SIZES))
    logits = jax.block_until_ready(forward(x_ids))

    ref = reference_forward(x_ids, raw, KERNEL_SIZES)
    assert logits.shape == (B, LABEL_NUM)
    assert jnp.allclose(logits, ref, atol=1e-5, rtol=1e-5), (logits, ref)

    print("KERNEL_OK")
</pallas_src>

<mosaic_0001>
module attributes {stable_mosaic.version = 11 : i64} {
  func.func @kernel(%arg0: i32, %arg1: memref<2x12x64xf32, #tpu.memory_space<vmem>>, %arg2: memref<8x128xf32, #tpu.memory_space<vmem>>, %arg3: memref<5x64x128xf32, #tpu.memory_space<vmem>>, %arg4: memref<1x128xf32, #tpu.memory_space<vmem>>, %arg5: memref<128x128xf32, #tpu.memory_space<vmem>>, %arg6: memref<1x128xf32, #tpu.memory_space<vmem>>, %arg7: memref<128x128xf32, #tpu.memory_space<vmem>>, %arg8: memref<1x128xf32, #tpu.memory_space<vmem>>, %arg9: memref<2x128xf32, #tpu.memory_space<vmem>>) attributes {dimension_semantics = [#tpu.dimension_semantics<parallel>], iteration_bounds = array<i64: 1>, scalar_prefetch = 0 : i64, scratch_operands = 0 : i64, tpu.core_type = #tpu.core_type<tc>, window_params = [{transform_indices = @transform_0, window_bounds = array<i64: 2, 12, 64>}, {pipeline_mode = #tpu.pipeline_mode<synchronous>, transform_indices = @transform_1, window_bounds = array<i64: 8, 128>}, {pipeline_mode = #tpu.pipeline_mode<synchronous>, transform_indices = @transform_2, window_bounds = array<i64: 5, 64, 128>}, {pipeline_mode = #tpu.pipeline_mode<synchronous>, transform_indices = @transform_3, window_bounds = array<i64: 1, 128>}, {pipeline_mode = #tpu.pipeline_mode<synchronous>, transform_indices = @transform_4, window_bounds = array<i64: 128, 128>}, {pipeline_mode = #tpu.pipeline_mode<synchronous>, transform_indices = @transform_5, window_bounds = array<i64: 1, 128>}, {pipeline_mode = #tpu.pipeline_mode<synchronous>, transform_indices = @transform_6, window_bounds = array<i64: 128, 128>}, {pipeline_mode = #tpu.pipeline_mode<synchronous>, transform_indices = @transform_7, window_bounds = array<i64: 1, 128>}, {transform_indices = @transform_8, window_bounds = array<i64: 2, 128>}]} {
    %cst = arith.constant 0.000000e+00 : f32
    %0 = vector.broadcast %cst : f32 to vector<16x128xf32>
    %c0 = arith.constant 0 : index
    %c0_0 = arith.constant 0 : index
    %c0_1 = arith.constant 0 : index
    %1 = vector.load %arg1[%c0, %c0_0, %c0_1] : memref<2x12x64xf32, #tpu.memory_space<vmem>>, vector<2x8x64xf32>
    %2 = vector.shape_cast %1 : vector<2x8x64xf32> to vector<16x64xf32>
    %c0_2 = arith.constant 0 : index
    %c0_3 = arith.constant 0 : index
    %c0_4 = arith.constant 0 : index
    %3 = vector.load %arg3[%c0_2, %c0_3, %c0_4] : memref<5x64x128xf32, #tpu.memory_space<vmem>>, vector<1x64x128xf32>
    %4 = vector.shape_cast %3 : vector<1x64x128xf32> to vector<64x128xf32>
    %cst_5 = arith.constant dense<0.000000e+00> : vector<16x128xf32>
    %5 = tpu.matmul %2, %4, %cst_5 {dimension_numbers = #tpu.dot_dimension_numbers<[1], [0], [0], [1], [0, 0, 1, 1], [], []>} : vector<16x64xf32>, vector<64x128xf32>, vector<16x128xf32> -> vector<16x128xf32>
    %6 = arith.addf %0, %5 : vector<16x128xf32>
    %c0_6 = arith.constant 0 : index
    %c1 = arith.constant 1 : index
    %c0_7 = arith.constant 0 : index
    %7 = vector.load %arg1[%c0_6, %c1, %c0_7] : memref<2x12x64xf32, #tpu.memory_space<vmem>>, vector<2x8x64xf32>
    %8 = vector.shape_cast %7 : vector<2x8x64xf32> to vector<16x64xf32>
    %c1_8 = arith.constant 1 : index
    %c0_9 = arith.constant 0 : index
    %c0_10 = arith.constant 0 : index
    %9 = vector.load %arg3[%c1_8, %c0_9, %c0_10] : memref<5x64x128xf32, #tpu.memory_space<vmem>>, vector<1x64x128xf32>
    %10 = vector.shape_cast %9 : vector<1x64x128xf32> to vector<64x128xf32>
    %cst_11 = arith.constant dense<0.000000e+00> : vector<16x128xf32>
    %11 = tpu.matmul %8, %10, %cst_11 {dimension_numbers = #tpu.dot_dimension_numbers<[1], [0], [0], [1], [0, 0, 1, 1], [], []>} : vector<16x64xf32>, vector<64x128xf32>, vector<16x128xf32> -> vector<16x128xf32>
    %12 = arith.addf %6, %11 : vector<16x128xf32>
    %c0_12 = arith.constant 0 : index
    %c2 = arith.constant 2 : index
    %c0_13 = arith.constant 0 : index
    %13 = vector.load %arg1[%c0_12, %c2, %c0_13] : memref<2x12x64xf32, #tpu.memory_space<vmem>>, vector<2x8x64xf32>
    %14 = vector.shape_cast %13 : vector<2x8x64xf32> to vector<16x64xf32>
    %c2_14 = arith.constant 2 : index
    %c0_15 = arith.constant 0 : index
    %c0_16 = arith.constant 0 : index
    %15 = vector.load %arg3[%c2_14, %c0_15, %c0_16] : memref<5x64x128xf32, #tpu.memory_space<vmem>>, vector<1x64x128xf32>
    %16 = vector.shape_cast %15 : vector<1x64x128xf32> to vector<64x128xf32>
    %cst_17 = arith.constant dense<0.000000e+00> : vector<16x128xf32>
    %17 = tpu.matmul %14, %16, %cst_17 {dimension_numbers = #tpu.dot_dimension_numbers<[1], [0], [0], [1], [0, 0, 1, 1], [], []>} : vector<16x64xf32>, vector<64x128xf32>, vector<16x128xf32> -> vector<16x128xf32>
    %18 = arith.addf %12, %17 : vector<16x128xf32>
    %c0_18 = arith.constant 0 : index
    %c3 = arith.constant 3 : index
    %c0_19 = arith.constant 0 : index
    %19 = vector.load %arg1[%c0_18, %c3, %c0_19] : memref<2x12x64xf32, #tpu.memory_space<vmem>>, vector<2x8x64xf32>
    %20 = vector.shape_cast %19 : vector<2x8x64xf32> to vector<16x64xf32>
    %c3_20 = arith.constant 3 : index
    %c0_21 = arith.constant 0 : index
    %c0_22 = arith.constant 0 : index
    %21 = vector.load %arg3[%c3_20, %c0_21, %c0_22] : memref<5x64x128xf32, #tpu.memory_space<vmem>>, vector<1x64x128xf32>
    %22 = vector.shape_cast %21 : vector<1x64x128xf32> to vector<64x128xf32>
    %cst_23 = arith.constant dense<0.000000e+00> : vector<16x128xf32>
    %23 = tpu.matmul %20, %22, %cst_23 {dimension_numbers = #tpu.dot_dimension_numbers<[1], [0], [0], [1], [0, 0, 1, 1], [], []>} : vector<16x64xf32>, vector<64x128xf32>, vector<16x128xf32> -> vector<16x128xf32>
    %24 = arith.addf %18, %23 : vector<16x128xf32>
    %c0_24 = arith.constant 0 : index
    %c4 = arith.constant 4 : index
    %c0_25 = arith.constant 0 : index
    %25 = vector.load %arg1[%c0_24, %c4, %c0_25] : memref<2x12x64xf32, #tpu.memory_space<vmem>>, vector<2x8x64xf32>
    %26 = vector.shape_cast %25 : vector<2x8x64xf32> to vector<16x64xf32>
    %c4_26 = arith.constant 4 : index
    %c0_27 = arith.constant 0 : index
    %c0_28 = arith.constant 0 : index
    %27 = vector.load %arg3[%c4_26, %c0_27, %c0_28] : memref<5x64x128xf32, #tpu.memory_space<vmem>>, vector<1x64x128xf32>
    %28 = vector.shape_cast %27 : vector<1x64x128xf32> to vector<64x128xf32>
    %cst_29 = arith.constant dense<0.000000e+00> : vector<16x128xf32>
    %29 = tpu.matmul %26, %28, %cst_29 {dimension_numbers = #tpu.dot_dimension_numbers<[1], [0], [0], [1], [0, 0, 1, 1], [], []>} : vector<16x64xf32>, vector<64x128xf32>, vector<16x128xf32> -> vector<16x128xf32>
    %30 = arith.addf %24, %29 : vector<16x128xf32>
    %31 = vector.shape_cast %30 : vector<16x128xf32> to vector<2x8x128xf32>
    %c0_30 = arith.constant 0 : index
    %c0_31 = arith.constant 0 : index
    %32 = vector.load %arg2[%c0_30, %c0_31] : memref<8x128xf32, #tpu.memory_space<vmem>>, vector<8x128xf32>
    %33 = vector.shape_cast %32 : vector<8x128xf32> to vector<1x8x128xf32>
    %34 = vector.broadcast %33 : vector<1x8x128xf32> to vector<2x8x128xf32>
    %35 = arith.addf %31, %34 : vector<2x8x128xf32>
    %cst_32 = arith.constant dense<0xFF800000> : vector<2x128xf32>
    %36 = vector.multi_reduction <maximumf>, %35, %cst_32 [1] : vector<2x8x128xf32> to vector<2x128xf32>
    %c0_33 = arith.constant 0 : index
    %c0_34 = arith.constant 0 : index
    %37 = vector.load %arg4[%c0_33, %c0_34] : memref<1x128xf32, #tpu.memory_space<vmem>>, vector<1x128xf32>
    %38 = vector.broadcast %37 : vector<1x128xf32> to vector<2x128xf32>
    %39 = arith.addf %36, %38 : vector<2x128xf32>
    %cst_35 = arith.constant 0.000000e+00 : f32
    %40 = vector.broadcast %cst_35 : f32 to vector<2x128xf32>
    %41 = arith.maximumf %39, %40 : vector<2x128xf32>
    %c0_36 = arith.constant 0 : index
    %c0_37 = arith.constant 0 : index
    %42 = vector.load %arg5[%c0_36, %c0_37] : memref<128x128xf32, #tpu.memory_space<vmem>>, vector<128x128xf32>
    %cst_38 = arith.constant dense<0.000000e+00> : vector<2x128xf32>
    %43 = tpu.matmul %41, %42, %cst_38 {dimension_numbers = #tpu.dot_dimension_numbers<[1], [0], [0], [1], [0, 0, 1, 1], [], []>} : vector<2x128xf32>, vector<128x128xf32>, vector<2x128xf32> -> vector<2x128xf32>
    %c0_39 = arith.constant 0 : index
    %c0_40 = arith.constant 0 : index
    %44 = vector.load %arg6[%c0_39, %c0_40] : memref<1x128xf32, #tpu.memory_space<vmem>>, vector<1x128xf32>
    %45 = vector.broadcast %44 : vector<1x128xf32> to vector<2x128xf32>
    %46 = arith.addf %43, %45 : vector<2x128xf32>
    %cst_41 = arith.constant 0.000000e+00 : f32
    %47 = vector.broadcast %cst_41 : f32 to vector<2x128xf32>
    %48 = arith.maximumf %46, %47 : vector<2x128xf32>
    %c0_42 = arith.constant 0 : index
    %c0_43 = arith.constant 0 : index
    %49 = vector.load %arg7[%c0_42, %c0_43] : memref<128x128xf32, #tpu.memory_space<vmem>>, vector<128x128xf32>
    %cst_44 = arith.constant dense<0.000000e+00> : vector<2x128xf32>
    %50 = tpu.matmul %48, %49, %cst_44 {dimension_numbers = #tpu.dot_dimension_numbers<[1], [0], [0], [1], [0, 0, 1, 1], [], []>} : vector<2x128xf32>, vector<128x128xf32>, vector<2x128xf32> -> vector<2x128xf32>
    %c0_45 = arith.constant 0 : index
    %c0_46 = arith.constant 0 : index
    %51 = vector.load %arg8[%c0_45, %c0_46] : memref<1x128xf32, #tpu.memory_space<vmem>>, vector<1x128xf32>
    %52 = vector.broadcast %51 : vector<1x128xf32> to vector<2x128xf32>
    %53 = arith.addf %50, %52 : vector<2x128xf32>
    %c0_47 = arith.constant 0 : index
    %c0_48 = arith.constant 0 : index
    %54 = vector.load %arg9[%c0_47, %c0_48] : memref<2x128xf32, #tpu.memory_space<vmem>>, vector<2x128xf32>
    tpu.vector_store %arg9[%c0_47, %c0_48], %53 {strides = array<i32>} : memref<2x128xf32, #tpu.memory_space<vmem>>, vector<2x128xf32>,
    return
  }
  func.func @transform_0(%arg0: i32) -> (i32, i32, i32) {
    %c0_i32 = arith.constant 0 : i32
    %c0_i32_0 = arith.constant 0 : i32
    %c0_i32_1 = arith.constant 0 : i32
    return %arg0, %c0_i32, %c0_i32_0 : i32, i32, i32
  }
  func.func @transform_1(%arg0: i32) -> (i32, i32) {
    %c0_i32 = arith.constant 0 : i32
    %c0_i32_0 = arith.constant 0 : i32
    %c0_i32_1 = arith.constant 0 : i32
    return %c0_i32, %c0_i32_0 : i32, i32
  }
  func.func @transform_2(%arg0: i32) -> (i32, i32, i32) {
    %c0_i32 = arith.constant 0 : i32
    %c0_i32_0 = arith.constant 0 : i32
    %c0_i32_1 = arith.constant 0 : i32
    %c0_i32_2 = arith.constant 0 : i32
    return %c0_i32, %c0_i32_0, %c0_i32_1 : i32, i32, i32
  }
  func.func @transform_3(%arg0: i32) -> (i32, i32) {
    %c0_i32 = arith.constant 0 : i32
    %c0_i32_0 = arith.constant 0 : i32
    %c0_i32_1 = arith.constant 0 : i32
    return %c0_i32, %c0_i32_0 : i32, i32
  }
  func.func @transform_4(%arg0: i32) -> (i32, i32) {
    %c0_i32 = arith.constant 0 : i32
    %c0_i32_0 = arith.constant 0 : i32
    %c0_i32_1 = arith.constant 0 : i32
    return %c0_i32, %c0_i32_0 : i32, i32
  }
  func.func @transform_5(%arg0: i32) -> (i32, i32) {
    %c0_i32 = arith.constant 0 : i32
    %c0_i32_0 = arith.constant 0 : i32
    %c0_i32_1 = arith.constant 0 : i32
    return %c0_i32, %c0_i32_0 : i32, i32
  }
  func.func @transform_6(%arg0: i32) -> (i32, i32) {
    %c0_i32 = arith.constant 0 : i32
    %c0_i32_0 = arith.constant 0 : i32
    %c0_i32_1 = arith.constant 0 : i32
    return %c0_i32, %c0_i32_0 : i32, i32
  }
  func.func @transform_7(%arg0: i32) -> (i32, i32) {
    %c0_i32 = arith.constant 0 : i32
    %c0_i32_0 = arith.constant 0 : i32
    %c0_i32_1 = arith.constant 0 : i32
    return %c0_i32, %c0_i32_0 : i32, i32
  }
  func.func @transform_8(%arg0: i32) -> (i32, i32) {
    %c0_i32 = arith.constant 0 : i32
    %c0_i32_0 = arith.constant 0 : i32
    return %arg0, %c0_i32 : i32, i32
  }
}

</mosaic_0001>

<bundles_post_ra>
// kernel: _lambda_.1
= control target key start
LH: loop header
LB: loop body
LE: loop exit
PB: predicated region body
PF: predicated region fallthrough
CT: control target
= control target key end

     0   :  { %13 = vsyncpa [#allocation3], 0  ;;  %s1427_s0 = inlined_call_operand.vmem [shape: f32[2,12,64], index: 0, kind: input, shape index: {}]   ;;  %s1428_s1 = inlined_call_operand.hbm [shape: f32[8,128], index: 1, kind: input, shape index: {}]   ;;  %s1429_s2 = inlined_call_operand.vmem [shape: f32[5,64,128], index: 2, kind: input, shape index: {}]   ;;  %s1430_s3 = inlined_call_operand.vmem [shape: f32[1,128], index: 3, kind: input, shape index: {}]   ;;  %s1431_s4 = inlined_call_operand.hbm [shape: f32[128,128], index: 4, kind: input, shape index: {}]   ;;  %s1432_s5 = inlined_call_operand.vmem [shape: f32[1,128], index: 5, kind: input, shape index: {}]   ;;  %s1433_s6 = inlined_call_operand.hbm [shape: f32[128,128], index: 6, kind: input, shape index: {}]   ;;  %s1434_s7 = inlined_call_operand.vmem [shape: f32[1,128], index: 7, kind: input, shape index: {}]   ;;  %s1435_s8 = inlined_call_operand.hbm [shape: f32[2,128], index: 8, kind: output, shape index: {}]  }
   0x1   :  { %14 = vsyncpa [#allocation6], 0 }
   0x2   :  { %15 = vsyncpa [#allocation4], 0  ;;  %s1159_s27 = smov [#allocation5]  }
   0x3   :  { %s37_s28 = sshll.u32 %s1159_s27, 4  ;;  %s38_s28 = int_to_ptr.vmem [resolvable:$true] %s37_s28 }
   0x4   :  { %s1081_s29 = scalar_lea.vmem %s38_s28, 2048  ;;  %p1086_p1 = scmp.lt.s32.totalorder %s38_s28, %s38_s28 }
   0x5   :  { %p1082_p0 = scmp.ne.s32.totalorder %s38_s28, %s1081_s29  ;;  %p1087_p2 = scmp.lt.s32.totalorder %s1081_s29, %s1081_s29 }
   0x7   :  { %p1088_p3 = por %p1087_p2, %p1086_p1 }
   0x9   :  { %p1089_p4 = pnand %p1088_p3, %p1082_p0 }
   0xb   :  { %1092 = shalt.err (!%p1089_p4)
}
   0xc   :  { %s1160_s30 = smov 128   ;;  %s1161_s9 = smov 8  }
   0xd   :  { %43 = dma.hbm_to_vmem [thread:$0]  %s1431_s4, 2048, %s38_s28, [#allocation6], %s1160_s30, %s1160_s30, %s1161_s9  }
   0xe   :  { %s1162_s12 = smov [#allocation2]   ;;  %s1163_s14 = smov [#allocation7]  }
   0xf   :  { %s24_s13 = sshll.u32 %s1162_s12, 4  ;;  %s51_s15 = sshll.u32 %s1163_s14, 4  ;;  %s25_s13 = int_to_ptr.vmem [resolvable:$true] %s24_s13  ;;  %s52_s15 = int_to_ptr.vmem [resolvable:$true] %s51_s15 }
  0x10   :  { %s1101_s16 = scalar_lea.vmem %s25_s13, 128  ;;  %p1106_p6 = scmp.lt.s32.totalorder %s25_s13, %s25_s13 }
  0x11   :  { %p1102_p5 = scmp.ne.s32.totalorder %s25_s13, %s1101_s16  ;;  %p1107_p7 = scmp.lt.s32.totalorder %s1101_s16, %s1101_s16 }
  0x13   :  { %p1108_p8 = por %p1107_p7, %p1106_p6 }
  0x15   :  { %p1109_p9 = pnand %p1108_p8, %p1102_p5 }
  0x17   :  { %1112 = shalt.err (!%p1109_p9)
}
  0x18   :  { %27 = dma.hbm_to_vmem [thread:$0]  %s1428_s1, 128, %s25_s13, [#allocation3]  }
  0x19   :  { %s1121_s19 = scalar_lea.vmem %s52_s15, 2048  ;;  %p1126_p11 = scmp.lt.s32.totalorder %s52_s15, %s52_s15 }
  0x1a   :  { %p1122_p10 = scmp.ne.s32.totalorder %s52_s15, %s1121_s19  ;;  %p1127_p12 = scmp.lt.s32.totalorder %s1121_s19, %s1121_s19 }
  0x1c   :  { %p1128_p13 = por %p1127_p12, %p1126_p11 }
  0x1e   :  { %p1129_p0 = pnand %p1128_p13, %p1122_p10 }
  0x20   :  { %1132 = shalt.err (!%p1129_p0)
}
  0x21   :  { %57 = dma.hbm_to_vmem [thread:$0]  %s1433_s6, 2048, %s52_s15, [#allocation6], %s1160_s30, %s1160_s30, %s1161_s9  }
  0x22   :  { %1153 = dma.done.wait [#allocation3], 128  }
  0x23   :  { %1154 = vsyncadd [#allocation3], 4294967168 }
  0x24   :  { %1155 = dma.done.wait [#allocation6], 4096  }
  0x25   :  { %1156 = vsyncadd [#allocation6], 4294963200  ;;  %v778_v0 = vld [vmem:[%s1429_s2 + $0x78] sm:$0xff]  ;;  %v777_v2 = vld [vmem:[%s1429_s2 + $0x70] sm:$0xff]  ;;  %vm90_vm0 = vcmask 523264   ;;  %v1164_v51 = vmov 0.0  }
  0x26   :  { %v78_v1 = vld [vmem:[%s1429_s2 + $0x38] sm:$0xff]  ;;  %900 = vmatprep.subr.mxu0 %v778_v0  ;;  %v77_v3 = vld [vmem:[%s1429_s2 + $0x30] sm:$0xff]  ;;  %v776_v4 = vld [vmem:[%s1429_s2 + $0x68] sm:$0xff]  ;;  %vm1165_vm1 = vmmov 0   ;;  %vm587_vm2 = vcmask 1041409   ;;  %s1166_s23 = smov [#allocation8]  }
  0x27   :  { %919 = vmatprep.subr.mxu1 %v78_v1  ;;  %901 = vmatpush3.msra.mxu0 %v778_v0  ;;  %v76_v5 = vld [vmem:[%s1429_s2 + $0x28] sm:$0xff]  ;;  %v775_v6 = vld [vmem:[%s1429_s2 + $0x60] sm:$0xff]  ;;  %v774_v8 = vld [vmem:[%s1429_s2 + $0x58] sm:$0xff]  ;;  %s761_s24 = sshll.u32 %s1166_s23, 4  ;;  %s762_s24 = int_to_ptr.vmem [resolvable:$true] %s761_s24 }
  0x28   :  { %920 = vmatpush3.msra.mxu1 %v78_v1  ;;  %902 = vmatprep.subr.mxu0 %v777_v2  ;;  %v75_v7 = vld [vmem:[%s1429_s2 + $0x20] sm:$0xff]  ;;  %v74_v9 = vld [vmem:[%s1429_s2 + $0x18] sm:$0xff]  ;;  %v773_v10 = vld [vmem:[%s1429_s2 + $0x50] sm:$0xff]  ;;  %s1133_s25 = scalar_lea.vmem %s762_s24, 32  ;;  %p1138_p2 = scmp.lt.s32.totalorder %s762_s24, %s762_s24 }
  0x29   :  { %921 = vmatprep.subr.mxu1 %v77_v3  ;;  %903 = vmatpush3.msra.mxu0 %v777_v2  ;;  %v73_v11 = vld [vmem:[%s1429_s2 + $0x10] sm:$0xff]  ;;  %v772_v12 = vld [vmem:[%s1429_s2 + $0x48] sm:$0xff]  ;;  %v771_v14 = vld [vmem:[%s1429_s2 + $0x40] sm:$0xff]  ;;  %p1134_p1 = scmp.ne.s32.totalorder %s762_s24, %s1133_s25  ;;  %p1139_p3 = scmp.lt.s32.totalorder %s1133_s25, %s1133_s25 }
  0x2a   :  { %922 = vmatpush3.msra.mxu1 %v77_v3  ;;  %904 = vmatprep.subr.mxu0 %v776_v4  ;;  %v72_v13 = vld [vmem:[%s1429_s2 + $0x8] sm:$0xff]  ;;  %v71_v15 = vld [vmem:[%s1429_s2] sm:$0xff]  ;;  %v80_v18 = vld [vmem:[%s1427_s0 + $0x11] sm:$0xff] }
  0x2b   :  { %923 = vmatprep.subr.mxu1 %v76_v5  ;;  %905 = vmatpush3.msra.mxu0 %v776_v4  ;;  %v79_v16 = vld [vmem:[%s1427_s0 + $0x1] sm:$0xff]  ;;  %v70_v19 = vld [vmem:[%s1427_s0 + $0x10] sm:$0xff]  ;;  %v790_v20 = vld [vmem:[%s1429_s2 + $0xb8] sm:$0xff]  ;;  %p1140_p4 = por %p1139_p3, %p1138_p2 }
  0x2c   :  { %924 = vmatpush3.msra.mxu1 %v76_v5  ;;  %906 = vmatprep.subr.mxu0 %v775_v6  ;;  %v69_v17 = vld [vmem:[%s1427_s0] sm:$0xff]  ;;  %v800_v21 = vld [vmem:[%s1429_s2 + $0xf8] sm:$0xff]  ;;  %v789_v22 = vld [vmem:[%s1429_s2 + $0xb0] sm:$0xff] }
  0x2d   :  { %925 = vmatprep.subr.mxu1 %v75_v7  ;;  %907 = vmatpush3.msra.mxu0 %v775_v6  ;;  %v799_v23 = vld [vmem:[%s1429_s2 + $0xf0] sm:$0xff]  ;;  %v788_v24 = vld [vmem:[%s1429_s2 + $0xa8] sm:$0xff]  ;;  %v787_v26 = vld [vmem:[%s1429_s2 + $0xa0] sm:$0xff]  ;;  %p1141_p5 = pnand %p1140_p4, %p1134_p1 }
  0x2e   :  { %926 = vmatpush3.msra.mxu1 %v75_v7  ;;  %908 = vmatprep.subr.mxu0 %v774_v8  ;;  %v798_v25 = vld [vmem:[%s1429_s2 + $0xe8] sm:$0xff]  ;;  %v797_v27 = vld [vmem:[%s1429_s2 + $0xe0] sm:$0xff]  ;;  %v786_v28 = vld [vmem:[%s1429_s2 + $0x98] sm:$0xff] }
  0x2f   :  { %927 = vmatprep.subr.mxu1 %v74_v9  ;;  %909 = vmatpush3.msra.mxu0 %v774_v8  ;;  %v796_v29 = vld [vmem:[%s1429_s2 + $0xd8] sm:$0xff]  ;;  %v785_v30 = vld [vmem:[%s1429_s2 + $0x90] sm:$0xff]  ;;  %v784_v32 = vld [vmem:[%s1429_s2 + $0x88] sm:$0xff] }
  0x30   :  { %928 = vmatpush3.msra.mxu1 %v74_v9  ;;  %910 = vmatprep.subr.mxu0 %v773_v10  ;;  %v795_v31 = vld [vmem:[%s1429_s2 + $0xd0] sm:$0xff]  ;;  %v794_v33 = vld [vmem:[%s1429_s2 + $0xc8] sm:$0xff]  ;;  %v783_v35 = vld [vmem:[%s1429_s2 + $0x80] sm:$0xff] }
  0x31   :  { %929 = vmatprep.subr.mxu1 %v73_v11  ;;  %911 = vmatpush3.msra.mxu0 %v773_v10  ;;  %v253_v34 = vld [vmem:[%s1427_s0 + $0x2] sm:$0xff]  ;;  %v254_v37 = vld [vmem:[%s1427_s0 + $0x12] sm:$0xff] }
  0x32   :  { %930 = vmatpush3.msra.mxu1 %v73_v11  ;;  %912 = vmatprep.subr.mxu0 %v772_v12  ;;  %v793_v36 = vld [vmem:[%s1429_s2 + $0xc0] sm:$0xff]  ;;  %v810_v38 = vld [vmem:[%s1429_s2 + $0x138] sm:$0xff]  ;;  %v809_v41 = vld [vmem:[%s1429_s2 + $0x130] sm:$0xff] }
  0x33   :  { %931 = vmatprep.subr.mxu1 %v72_v13  ;;  %913 = vmatpush3.msra.mxu0 %v772_v12  ;;  %v347_v39 = vld [vmem:[%s1427_s0 + $0x3] sm:$0xff]  ;;  %v348_v40 = vld [vmem:[%s1427_s0 + $0x13] sm:$0xff] }
  0x34   :  { %932 = vmatpush3.msra.mxu1 %v72_v13  ;;  %914 = vmatprep.subr.mxu0 %v771_v14  ;;  %v441_v42 = vld [vmem:[%s1427_s0 + $0x4] sm:$0xff]  ;;  %v806_v45 = vld [vmem:[%s1429_s2 + $0x118] sm:$0xff]  ;;  %v805_v46 = vld [vmem:[%s1429_s2 + $0x110] sm:$0xff] }
  0x35   :  { %933 = vmatprep.subr.mxu1 %v71_v15  ;;  %915 = vmatpush3.msra.mxu0 %v771_v14  ;;  %v808_v43 = vld [vmem:[%s1429_s2 + $0x128] sm:$0xff]  ;;  %v807_v44 = vld [vmem:[%s1429_s2 + $0x120] sm:$0xff]  ;;  %v442_v49 = vld [vmem:[%s1427_s0 + $0x14] sm:$0xff] }
  0x36   :  { %916 = vmatprep.mubr.msk.f32.mxu0 %vm90_vm0, %v79_v16  ;;  %934 = vmatpush3.msra.mxu1 %v71_v15  ;;  %v804_v47 = vld [vmem:[%s1429_s2 + $0x108] sm:$0xff]  ;;  %v803_v48 = vld [vmem:[%s1429_s2 + $0x100] sm:$0xff]  ;;  %v575_v52 = vld [vmem:[#allocation5 + $0x70] sm:$0xff] }
  0x37   :  { %935 = vmatprep.mubr.msk.f32.mxu1 %vm90_vm0, %v69_v17  ;;  %917 = vmatmul.mubr.msk.f32.vlgmr.msra.gmra.mxu0 %vm90_vm0, %v80_v18  ;;  %v576_v50 = vld [vmem:[#allocation5 + $0x78] sm:$0xff]  ;;  %v574_v53 = vld [vmem:[#allocation5 + $0x68] sm:$0xff]  ;;  %v573_v54 = vld [vmem:[#allocation5 + $0x60] sm:$0xff] }
  0x38   :  { %936 = vmatmul.mubr.msk.f32.vlgmr.msra.gmra.mxu1 %vm90_vm0, %v70_v19  ;;  %938 = vmatprep.subr.mxu0 %v790_v20  ;;  %v572_v55 = vld [vmem:[#allocation5 + $0x58] sm:$0xff]  ;;  %v571_v56 = vld [vmem:[#allocation5 + $0x50] sm:$0xff]  ;;  %v570_v57 = vld [vmem:[#allocation5 + $0x48] sm:$0xff] }
  0x39   :  { %957 = vmatprep.subr.mxu1 %v800_v21  ;;  %939 = vmatpush3.msra.mxu0 %v790_v20  ;;  %v569_v58 = vld [vmem:[#allocation5 + $0x40] sm:$0xff]  ;;  %v568_v59 = vld [vmem:[#allocation5 + $0x38] sm:$0xff]  ;;  %v567_v60 = vld [vmem:[#allocation5 + $0x30] sm:$0xff] }
  0x3a   :  { %958 = vmatpush3.msra.mxu1 %v800_v21  ;;  %940 = vmatprep.subr.mxu0 %v789_v22  ;;  %v566_v61 = vld [vmem:[#allocation5 + $0x28] sm:$0xff]  ;;  %v565_v62 = vld [vmem:[#allocation5 + $0x20] sm:$0xff]  ;;  %v564_v63 = vld [vmem:[#allocation5 + $0x18] sm:$0xff] }
  0x3b   :  { %959 = vmatprep.subr.mxu1 %v799_v23  ;;  %941 = vmatpush3.msra.mxu0 %v789_v22  ;;  %v563_v0 = vld [vmem:[#allocation5 + $0x10] sm:$0xff]  ;;  %v562_v1 = vld [vmem:[#allocation5 + $0x8] sm:$0xff]  ;;  %v561_v2 = vld [vmem:[#allocation5] sm:$0xff] }
  0x3c   :  { %960 = vmatpush3.msra.mxu1 %v799_v23  ;;  %942 = vmatprep.subr.mxu0 %v788_v24  ;;  %v676_v3 = vld [vmem:[#allocation7 + $0x78] sm:$0xff]  ;;  %v675_v4 = vld [vmem:[#allocation7 + $0x70] sm:$0xff]  ;;  %v674_v5 = vld [vmem:[#allocation7 + $0x68] sm:$0xff] }
  0x3d   :  { %961 = vmatprep.subr.mxu1 %v798_v25  ;;  %943 = vmatpush3.msra.mxu0 %v788_v24  ;;  %v673_v6 = vld [vmem:[#allocation7 + $0x60] sm:$0xff]  ;;  %v672_v7 = vld [vmem:[#allocation7 + $0x58] sm:$0xff]  ;;  %v671_v8 = vld [vmem:[#allocation7 + $0x50] sm:$0xff] }
  0x3e   :  { %962 = vmatpush3.msra.mxu1 %v798_v25  ;;  %944 = vmatprep.subr.mxu0 %v787_v26  ;;  %v670_v9 = vld [vmem:[#allocation7 + $0x48] sm:$0xff]  ;;  %v669_v10 = vld [vmem:[#allocation7 + $0x40] sm:$0xff]  ;;  %v668_v11 = vld [vmem:[#allocation7 + $0x38] sm:$0xff] }
  0x3f   :  { %963 = vmatprep.subr.mxu1 %v797_v27  ;;  %945 = vmatpush3.msra.mxu0 %v787_v26  ;;  %v667_v12 = vld [vmem:[#allocation7 + $0x30] sm:$0xff]  ;;  %v666_v13 = vld [vmem:[#allocation7 + $0x28] sm:$0xff]  ;;  %v665_v14 = vld [vmem:[#allocation7 + $0x20] sm:$0xff] }
  0x40   :  { %964 = vmatpush3.msra.mxu1 %v797_v27  ;;  %946 = vmatprep.subr.mxu0 %v786_v28  ;;  %v664_v15 = vld [vmem:[#allocation7 + $0x18] sm:$0xff] }
  0x41   :  { %965 = vmatprep.subr.mxu1 %v796_v29  ;;  %947 = vmatpush3.msra.mxu0 %v786_v28 }
  0x42   :  { %966 = vmatpush3.msra.mxu1 %v796_v29  ;;  %948 = vmatprep.subr.mxu0 %v785_v30 }
  0x43   :  { %967 = vmatprep.subr.mxu1 %v795_v31  ;;  %949 = vmatpush3.msra.mxu0 %v785_v30  ;;  %v535_v30 = vld [vmem:[#allocation2] sm:$0xff] }
  0x44   :  { %968 = vmatpush3.msra.mxu1 %v795_v31  ;;  %950 = vmatprep.subr.mxu0 %v784_v32 }
  0x45   :  { %969 = vmatprep.subr.mxu1 %v794_v33  ;;  %951 = vmatpush3.msra.mxu0 %v784_v32 }
  0x46   :  { %954 = vmatprep.mubr.msk.f32.mxu0 %vm90_vm0, %v253_v34  ;;  %952 = vmatprep.subr.mxu0 %v783_v35 }
  0x47   :  { %970 = vmatpush3.msra.mxu1 %v794_v33  ;;  %953 = vmatpush3.msra.mxu0 %v783_v35 }
  0x48   :  { %971 = vmatprep.subr.mxu1 %v793_v36  ;;  %955 = vmatmul.mubr.msk.f32.vlgmr.msra.gmra.mxu0 %vm90_vm0, %v254_v37 }
  0x49   :  { %976 = vmatprep.subr.mxu0 %v810_v38  ;;  %972 = vmatpush3.msra.mxu1 %v793_v36 }
  0x4a   :  { %973 = vmatprep.mubr.msk.f32.mxu1 %vm90_vm0, %v347_v39  ;;  %977 = vmatpush3.msra.mxu0 %v810_v38 }
  0x4b   :  { %974 = vmatmul.mubr.msk.f32.vlgmr.msra.gmra.mxu1 %vm90_vm0, %v348_v40  ;;  %978 = vmatprep.subr.mxu0 %v809_v41 }
  0x4c   :  { %992 = vmatprep.mubr.msk.f32.mxu0 %vm90_vm0, %v441_v42  ;;  %979 = vmatpush3.msra.mxu0 %v809_v41 }
  0x4d   :  { %980 = vmatprep.subr.mxu0 %v808_v43  ;;  %995 = vmatprep.subr.mxu1 %v1164_v51 }
  0x4e   :  { %981 = vmatpush3.msra.mxu0 %v808_v43  ;;  %996 = vmatpush3.msra.mxu1 %v576_v50 }
  0x4f   :  { %982 = vmatprep.subr.mxu0 %v807_v44  ;;  %997 = vmatprep.subr.mxu1 %v1164_v51 }
  0x50   :  { %983 = vmatpush3.msra.mxu0 %v807_v44  ;;  %998 = vmatpush3.msra.mxu1 %v575_v52 }
  0x51   :  { %984 = vmatprep.subr.mxu0 %v806_v45  ;;  %999 = vmatprep.subr.mxu1 %v1164_v51 }
  0x52   :  { %985 = vmatpush3.msra.mxu0 %v806_v45  ;;  %1000 = vmatpush3.msra.mxu1 %v574_v53 }
  0x53   :  { %986 = vmatprep.subr.mxu0 %v805_v46  ;;  %1001 = vmatprep.subr.mxu1 %v1164_v51 }
  0x54   :  { %987 = vmatpush3.msra.mxu0 %v805_v46  ;;  %1002 = vmatpush3.msra.mxu1 %v573_v54  ;;  %v813_v46 = vld [vmem:[%s1430_s3] ss:$0 sm:$0xff] }
  0x55   :  { %988 = vmatprep.subr.mxu0 %v804_v47  ;;  %1003 = vmatprep.subr.mxu1 %v1164_v51 }
  0x56   :  { %989 = vmatpush3.msra.mxu0 %v804_v47  ;;  %1004 = vmatpush3.msra.mxu1 %v572_v55 }
  0x57   :  { %990 = vmatprep.subr.mxu0 %v803_v48  ;;  %1005 = vmatprep.subr.mxu1 %v1164_v51 }
  0x58   :  { %991 = vmatpush3.msra.mxu0 %v803_v48  ;;  %1006 = vmatpush3.msra.mxu1 %v571_v56 }
  0x59   :  { %993 = vmatmul.mubr.msk.f32.vlgmr.msra.gmra.mxu0 %vm90_vm0, %v442_v49  ;;  %1030 = vmatprep.subr.mxu0 %v1164_v51 }
  0x5a   :  { %1007 = vmatprep.subr.mxu1 %v1164_v51  ;;  %1027 = vmatprep.mubr.msk.f32.mxu1 %vm1165_vm1, %v1164_v51 }
  0x5b   :  { %1008 = vmatpush3.msra.mxu1 %v570_v57  ;;  %1062 = vmatprep.mubr.msk.f32.mxu0 %vm1165_vm1, %v1164_v51  ;;  %v663_v57 = vld [vmem:[#allocation7 + $0x10] sm:$0xff] }
  0x5c   :  { %1009 = vmatprep.subr.mxu1 %v1164_v51  ;;  %1031 = vmatpush3.msra.mxu0 %v676_v3 }
  0x5d   :  { %1010 = vmatpush3.msra.mxu1 %v569_v58  ;;  %1032 = vmatprep.subr.mxu0 %v1164_v51  ;;  %v662_v58 = vld [vmem:[#allocation7 + $0x8] sm:$0xff] }
  0x5e   :  { %1011 = vmatprep.subr.mxu1 %v1164_v51  ;;  %1033 = vmatpush3.msra.mxu0 %v675_v4 }
  0x5f   :  { %1012 = vmatpush3.msra.mxu1 %v568_v59  ;;  %1034 = vmatprep.subr.mxu0 %v1164_v51  ;;  %v661_v59 = vld [vmem:[#allocation7] sm:$0xff] }
  0x60   :  { %1013 = vmatprep.subr.mxu1 %v1164_v51  ;;  %1035 = vmatpush3.msra.mxu0 %v674_v5 }
  0x61   :  { %1014 = vmatpush3.msra.mxu1 %v567_v60  ;;  %1036 = vmatprep.subr.mxu0 %v1164_v51  ;;  %v814_v60 = vld [vmem:[%s1432_s5] ss:$0 sm:$0xff] }
  0x62   :  { %1015 = vmatprep.subr.mxu1 %v1164_v51  ;;  %1037 = vmatpush3.msra.mxu0 %v673_v6 }
  0x63   :  { %1016 = vmatpush3.msra.mxu1 %v566_v61  ;;  %1038 = vmatprep.subr.mxu0 %v1164_v51 }
  0x64   :  { %1017 = vmatprep.subr.mxu1 %v1164_v51  ;;  %1039 = vmatpush3.msra.mxu0 %v672_v7 }
  0x65   :  { %1018 = vmatpush3.msra.mxu1 %v565_v62  ;;  %1040 = vmatprep.subr.mxu0 %v1164_v51 }
  0x66   :  { %1019 = vmatprep.subr.mxu1 %v1164_v51  ;;  %1041 = vmatpush3.msra.mxu0 %v671_v8 }
  0x67   :  { %1020 = vmatpush3.msra.mxu1 %v564_v63  ;;  %1042 = vmatprep.subr.mxu0 %v1164_v51 }
  0x68   :  { %1021 = vmatprep.subr.mxu1 %v1164_v51  ;;  %1043 = vmatpush3.msra.mxu0 %v670_v9 }
  0x69   :  { %1022 = vmatpush3.msra.mxu1 %v563_v0  ;;  %1044 = vmatprep.subr.mxu0 %v1164_v51 }
  0x6a   :  { %1023 = vmatprep.subr.mxu1 %v1164_v51  ;;  %1045 = vmatpush3.msra.mxu0 %v669_v10 }
  0x6b   :  { %1024 = vmatpush3.msra.mxu1 %v562_v1  ;;  %1046 = vmatprep.subr.mxu0 %v1164_v51  ;;  %v815_v1 = vld [vmem:[%s1434_s7] ss:$0 sm:$0xff] }
  0x6c   :  { %1025 = vmatprep.subr.mxu1 %v1164_v51  ;;  %1047 = vmatpush3.msra.mxu0 %v668_v11 }
  0x6d   :  { %1026 = vmatpush3.msra.mxu1 %v561_v2  ;;  %1048 = vmatprep.subr.mxu0 %v1164_v51 }
  0x6e   :  { %1049 = vmatpush3.msra.mxu0 %v667_v12 }
  0x6f   :  { %1050 = vmatprep.subr.mxu0 %v1164_v51 }
  0x70   :  { %1051 = vmatpush3.msra.mxu0 %v666_v13 }
  0x71   :  { %1052 = vmatprep.subr.mxu0 %v1164_v51 }
  0x72   :  { %1053 = vmatpush3.msra.mxu0 %v665_v14 }
  0x73   :  { %1054 = vmatprep.subr.mxu0 %v1164_v51 }
  0x74   :  { %1055 = vmatpush3.msra.mxu0 %v664_v15 }
  0x75   :  { %1056 = vmatprep.subr.mxu0 %v1164_v51 }
  0x76   :  { %1057 = vmatpush3.msra.mxu0 %v663_v57 }
  0x77   :  { %1058 = vmatprep.subr.mxu0 %v1164_v51 }
  0x78   :  { %1059 = vmatpush3.msra.mxu0 %v662_v58 }
  0x79   :  { %1060 = vmatprep.subr.mxu0 %v1164_v51 }
  0x7a   :  { %1061 = vmatpush3.msra.mxu0 %v661_v59 }
  0xf7   :  { %v918_v16 = vpop.f32.mrf.mxu0 }
  0xf8   :  { %v937_v17 = vpop.f32.mrf.mxu1 }
  0xf9   :  { %v163_v18 = vpop.f32.mrf.mxu0  ;;  %v250_v21 = vadd.f32 %v937_v17, %v918_v16 }
  0xfa   :  { %v244_v20 = vpop.f32.mrf.mxu1 }
  0xfb   :  { %v245_v24 = vadd.f32 %v244_v20, %v163_v18 }
 0x108   :  { %v956_v19 = vpop.f32.mrf.mxu0 }
 0x109   :  { %v346_v25 = vadd.f32 %v956_v19, %v250_v21 }
 0x10a   :  { %v336_v22 = vpop.f32.mrf.mxu0 }
 0x10b   :  { %v975_v23 = vpop.f32.mrf.mxu1  ;;  %v345_v26 = vadd.f32 %v336_v22, %v245_v24 }
 0x10c   :  { %v440_v28 = vadd.f32 %v975_v23, %v346_v25 }
 0x10d   :  { %v430_v27 = vpop.f32.mrf.mxu1 }
 0x10e   :  { %v439_v31 = vadd.f32 %v430_v27, %v345_v26 }
 0x119   :  { %v994_v29 = vpop.f32.mrf.mxu0 }
 0x11a   :  { %v534_v32 = vadd.f32 %v994_v29, %v440_v28 }
 0x11b   :  { %v524_v33 = vpop.f32.mrf.mxu0 }
 0x11c   :  { %v537_v34 = vadd.f32 %v535_v30, %v534_v32  ;;  %v533_v35 = vadd.f32 %v524_v33, %v439_v31 }
 0x11e   :  { %v544_v36 = vrot.slane %v537_v34, 4  ;;  %v536_v37 = vadd.f32 %v535_v30, %v533_v35 }
 0x120   :  { %v545_v38 = vmax.f32 %v537_v34, %v544_v36  ;;  %v538_v39 = vrot.slane %v536_v37, 4 }
 0x122   :  { %v546_v40 = vrot.slane %v545_v38, 2  ;;  %v539_v41 = vmax.f32 %v536_v37, %v538_v39 }
 0x124   :  { %v547_v42 = vmax.f32 %v545_v38, %v546_v40  ;;  %v540_v43 = vrot.slane %v539_v41, 2 }
 0x126   :  { %v548_v44 = vrot.slane %v547_v42, 1  ;;  %v541_v45 = vmax.f32 %v539_v41, %v540_v43 }
 0x128   :  { %v549_v47 = vmax.f32 %v547_v42, %v548_v44  ;;  %v542_v48 = vrot.slane %v541_v45, 1 }
 0x12a   :  { %v543_v49 = vmax.f32 %v541_v45, %v542_v48  ;;  %v558_v50 = vadd.f32 %v813_v46, %v549_v47 }
 0x12c   :  { %v557_v52 = vadd.f32 %v813_v46, %v543_v49  ;;  %v560_v53 = vmax.f32 %v558_v50, 0.0 }
 0x12e   :  { %v559_v54 = vmax.f32 %v557_v52, 0.0  ;;  %v586_v55 = vrot.slane %v560_v53, 7 }
 0x130   :  { %v588_v56 = vsel %vm587_vm2, %v586_v55, %v559_v54 }
 0x131   :  { %1028 = vmatmul.mubr.f32.vlgmr.msra.gmra.mxu1 %v588_v56 }
 0x1f1   :  { %v656_v61 = vpop.f32.mrf.mxu1 }
 0x1f2   :  { %v657_v62 = vadd.f32 %v814_v60, %v656_v61 }
 0x1f3   :  { %v1029_v63 = vpop.f32.mrf.mxu1 }
 0x1f4   :  { %v660_v0 = vmax.f32 %v657_v62, 0.0 }
 0x1f6   :  { %1063 = vmatmul.mubr.f32.vlgmr.msra.gmra.mxu0 %v660_v0 }
 0x2b6   :  { %v750_v2 = vpop.f32.mrf.mxu0 }
 0x2b7   :  { %v751_v3 = vadd.f32 %v815_v1, %v750_v2 }
 0x2b8   :  { %v1064_v51 = vpop.f32.mrf.mxu0 }
 0x2b9   :  { %754 = vst [vmem:[#allocation8] sm:$0x3] %v751_v3 }
 0x2ba   :  { %1144 = shalt.err (!%p1141_p5)
}
 0x2bb   :  { %764 = dma.vmem_to_hbm [thread:$0]  %s762_s24, 32, %s1435_s8, [#allocation4]  }
 0x2bc   :  { %1157 = dma.done.wait [#allocation4], 32  }
 0x2bd   :  { %1158 = vsyncadd [#allocation4], 4294967264 }
 0x2be   :  { %768 = vsyncpa [#allocation3], 1 }
 0x2bf   :  { %769 = vsyncpa [#allocation6], 1 }
 0x2c0   :  { %770 = vsyncpa [#allocation4], 1 }

</bundles_post_ra>
